<compile_context>
chip_gen: v7x
topology: tpu7x:2x2x1
jax: 0.10.0
libtpu: 0.0.40
codegen_flags: <defaults>
</compile_context>

<pallas_src>
import math

import jax
import jax.numpy as jnp
from jax.experimental import pallas as pl
from jax.experimental.pallas import tpu as pltpu

LN_EPS = 1e-5  # PyTorch nn.LayerNorm default


def _layernorm_f32(h, gamma, beta):
    """Two-pass LayerNorm (biased variance, eps inside rsqrt) in f32."""
    mu = jnp.mean(h, axis=-1, keepdims=True)
    c = h - mu
    var = jnp.mean(c * c, axis=-1, keepdims=True)
    return c * jax.lax.rsqrt(var + LN_EPS) * gamma + beta


def critic_twin_kernel(sa_ref, w1_ref, w2_ref, vec_ref, out_ref):
    """Both Q-heads in one body.

    sa_ref : (B, K)      f32   concatenated [state, action]
    w1_ref : (K, 2H)     bf16  layer-1 weights, heads stacked along N
    w2_ref : (2, H, H)   bf16  layer-2 weights per head
    vec_ref: (2, 8, H)   f32   rows: b1,g1,be1,b2,g2,be2,w3,b3(broadcast)
    out_ref: (B, 2)      f32   q1 | q2
    """
    H = w2_ref.shape[-1]

    sa = sa_ref[...].astype(jnp.bfloat16)

    # Layer 1 for BOTH heads: one K=16, N=2H MXU matmul, f32 accumulation.
    h12 = jnp.dot(sa, w1_ref[...], preferred_element_type=jnp.float32)  # (B, 2H)

    qs = []
    for head in range(2):  # static unroll
        vec = vec_ref[head]          # (8, H)
        b1 = vec[0:1, :]
        g1 = vec[1:2, :]
        be1 = vec[2:3, :]
        b2 = vec[3:4, :]
        g2 = vec[4:5, :]
        be2 = vec[5:6, :]
        w3_row = vec[6:7, :]         # (1, H) final projection weights
        b3 = vec[7:8, 0:1]           # (1, 1) final bias

        # Layer 1 epilogue (per head): bias + LayerNorm + Tanh, all f32.
        h = h12[:, head * H:(head + 1) * H] + b1   # 128-lane aligned slice
        h = jnp.tanh(_layernorm_f32(h, g1, be1))

        # Layer 2: (H -> H) bf16 MXU matmul, f32 accumulate, LN + Tanh.
        h = jnp.dot(h.astype(jnp.bfloat16), w2_ref[head],
                    preferred_element_type=jnp.float32) + b2
        h = jnp.tanh(_layernorm_f32(h, g2, be2))

        # Output head: (H -> 1) as VPU multiply + lane reduction (skip N=1 MXU).
        q = jnp.sum(h * w3_row, axis=-1, keepdims=True) + b3   # (B, 1)
        qs.append(q)

    out_ref[...] = jnp.concatenate(qs, axis=-1).astype(out_ref.dtype)  # (B, 2)


@jax.jit
def critic_forward(state, action, packed_params):
    """Twin-Q forward. Returns (q1, q2), each (B, 1) float32."""
    w1, w2, vec = packed_params
    B = state.shape[0]
    K = w1.shape[0]
    H = w2.shape[-1]

    # Concat folded at trace time (tiny op); kernel sees a single (B, K) operand.
    sa = jnp.concatenate([state, action], axis=1)

    out = pl.pallas_call(
        critic_twin_kernel,
        out_shape=jax.ShapeDtypeStruct((B, 2), jnp.float32),
        grid=(1,),  # single step: both heads fused, minimal launch overhead
        in_specs=[
            pl.BlockSpec((B, K), lambda i: (0, 0)),
            pl.BlockSpec((K, 2 * H), lambda i: (0, 0)),
            pl.BlockSpec((2, H, H), lambda i: (0, 0, 0)),
            pl.BlockSpec((2, 8, H), lambda i: (0, 0, 0)),
        ],
        out_specs=pl.BlockSpec((B, 2), lambda i: (0, 0)),
        compiler_params=pltpu.CompilerParams(
            dimension_semantics=("arbitrary",)),
    )(sa, w1, w2, vec)

    return out[:, 0:1], out[:, 1:2]


# ----------------------------- parameter setup ------------------------------

def xavier_uniform(key, fan_in, fan_out, dtype=jnp.float32):
    bound = math.sqrt(6.0 / (fan_in + fan_out))
    return jax.random.uniform(key, (fan_in, fan_out), dtype, -bound, bound)


def make_head_params(key, state_dim, action_dim, hidden_dim):
    k1, k2, k3 = jax.random.split(key, 3)
    return dict(
        w1=xavier_uniform(k1, state_dim + action_dim, hidden_dim),
        b1=jnp.zeros((hidden_dim,), jnp.float32),
        g1=jnp.ones((hidden_dim,), jnp.float32),
        be1=jnp.zeros((hidden_dim,), jnp.float32),
        w2=xavier_uniform(k2, hidden_dim, hidden_dim),
        b2=jnp.zeros((hidden_dim,), jnp.float32),
        g2=jnp.ones((hidden_dim,), jnp.float32),
        be2=jnp.zeros((hidden_dim,), jnp.float32),
        w3=xavier_uniform(k3, hidden_dim, 1),
        b3=jnp.zeros((), jnp.float32),
    )


def pack_critic_params(p1, p2):
    """Heads stacked along N for layer 1; per-head slabs for everything else."""
    H = p1["w2"].shape[0]

    # (K, 2H) bf16: [head1 | head2] along the output axis.
    w1 = jnp.concatenate([p1["w1"], p2["w1"]], axis=1).astype(jnp.bfloat16)
    # (2, H, H) bf16.
    w2 = jnp.stack([p1["w2"], p2["w2"]], axis=0).astype(jnp.bfloat16)

    def slab(p):  # (8, H) f32
        return jnp.stack([
            p["b1"], p["g1"], p["be1"],
            p["b2"], p["g2"], p["be2"],
            p["w3"][:, 0],
            jnp.full((H,), p["b3"], jnp.float32),
        ], axis=0)

    vec = jnp.stack([slab(p1), slab(p2)], axis=0)  # (2, 8, H) f32
    return w1, w2, vec


# ------------------------------- reference ----------------------------------

def _ln_ref(h, g, b):
    mu = jnp.mean(h, axis=-1, keepdims=True)
    var = jnp.mean((h - mu) ** 2, axis=-1, keepdims=True)
    return (h - mu) * jax.lax.rsqrt(var + LN_EPS) * g + b


def _ref_head(state, action, p):
    # Reference uses the bf16-quantized weights (cast back to f32) so the only
    # kernel-vs-reference delta is bf16 activation rounding on the MXU path.
    sa = jnp.concatenate([state, action], axis=1)
    w1 = p["w1"].astype(jnp.bfloat16).astype(jnp.float32)
    w2 = p["w2"].astype(jnp.bfloat16).astype(jnp.float32)
    h = sa @ w1 + p["b1"]
    h = jnp.tanh(_ln_ref(h, p["g1"], p["be1"]))
    h = h @ w2 + p["b2"]
    h = jnp.tanh(_ln_ref(h, p["g2"], p["be2"]))
    return h @ p["w3"] + p["b3"]


# --------------------------------- main --------------------------------------

if __name__ == "__main__":
    key = jax.random.PRNGKey(0)
    B, state_dim, action_dim, hidden_dim = 8, 12, 4, 128

    k_s, k_a, k_q1, k_q2 = jax.random.split(key, 4)
    state = jax.random.normal(k_s, (B, state_dim), jnp.float32)
    action = jax.random.normal(k_a, (B, action_dim), jnp.float32)

    p1 = make_head_params(k_q1, state_dim, action_dim, hidden_dim)
    p2 = make_head_params(k_q2, state_dim, action_dim, hidden_dim)
    packed = pack_critic_params(p1, p2)

    q1, q2 = critic_forward(state, action, packed)
    jax.block_until_ready((q1, q2))

    # correctness check vs pure-JAX reference (bf16 weights -> loosened tol)
    r1 = _ref_head(state, action, p1)
    r2 = _ref_head(state, action, p2)
    assert q1.shape == (B, 1) and q2.shape == (B, 1)
    assert bool(jnp.all(jnp.isfinite(q1))) and bool(jnp.all(jnp.isfinite(q2)))
    assert jnp.allclose(q1, r1, atol=5e-2, rtol=5e-2)
    assert jnp.allclose(q2, r2, atol=5e-2, rtol=5e-2)

    print("KERNEL_OK")
</pallas_src>

<mosaic_0001>
module attributes {stable_mosaic.version = 11 : i64} {
  func.func @critic_twin_kernel(%arg0: i32, %arg1: memref<8x16xf32, #tpu.memory_space<vmem>>, %arg2: memref<16x256xbf16, #tpu.memory_space<vmem>>, %arg3: memref<2x128x128xbf16, #tpu.memory_space<vmem>>, %arg4: memref<2x8x128xf32, #tpu.memory_space<vmem>>, %arg5: memref<8x2xf32, #tpu.memory_space<vmem>>) attributes {dimension_semantics = [#tpu.dimension_semantics<arbitrary>], iteration_bounds = array<i64: 1>, scalar_prefetch = 0 : i64, scratch_operands = 0 : i64, tpu.core_type = #tpu.core_type<tc>, window_params = [{pipeline_mode = #tpu.pipeline_mode<synchronous>, transform_indices = @transform_0, window_bounds = array<i64: 8, 16>}, {pipeline_mode = #tpu.pipeline_mode<synchronous>, transform_indices = @transform_1, window_bounds = array<i64: 16, 256>}, {pipeline_mode = #tpu.pipeline_mode<synchronous>, transform_indices = @transform_2, window_bounds = array<i64: 2, 128, 128>}, {pipeline_mode = #tpu.pipeline_mode<synchronous>, transform_indices = @transform_3, window_bounds = array<i64: 2, 8, 128>}, {pipeline_mode = #tpu.pipeline_mode<synchronous>, transform_indices = @transform_4, window_bounds = array<i64: 8, 2>}]} {
    %c0 = arith.constant 0 : index
    %c0_0 = arith.constant 0 : index
    %0 = vector.load %arg1[%c0, %c0_0] : memref<8x16xf32, #tpu.memory_space<vmem>>, vector<8x16xf32>
    %1 = arith.truncf %0 : vector<8x16xf32> to vector<8x16xbf16>
    %c0_1 = arith.constant 0 : index
    %c0_2 = arith.constant 0 : index
    %2 = vector.load %arg2[%c0_1, %c0_2] : memref<16x256xbf16, #tpu.memory_space<vmem>>, vector<16x256xbf16>
    %cst = arith.constant dense<0.000000e+00> : vector<8x256xf32>
    %3 = tpu.matmul %1, %2, %cst {dimension_numbers = #tpu.dot_dimension_numbers<[1], [0], [0], [1], [0, 0, 1, 1], [], []>} : vector<8x16xbf16>, vector<16x256xbf16>, vector<8x256xf32> -> vector<8x256xf32>
    %c0_3 = arith.constant 0 : index
    %c0_4 = arith.constant 0 : index
    %c0_5 = arith.constant 0 : index
    %4 = vector.load %arg4[%c0_3, %c0_4, %c0_5] : memref<2x8x128xf32, #tpu.memory_space<vmem>>, vector<1x8x128xf32>
    %5 = vector.shape_cast %4 : vector<1x8x128xf32> to vector<8x128xf32>
    %6 = vector.extract_strided_slice %5 {offsets = [0, 0], sizes = [1, 128], strides = [1, 1]} : vector<8x128xf32> to vector<1x128xf32>
    %7 = vector.extract_strided_slice %5 {offsets = [1, 0], sizes = [1, 128], strides = [1, 1]} : vector<8x128xf32> to vector<1x128xf32>
    %8 = vector.extract_strided_slice %5 {offsets = [2, 0], sizes = [1, 128], strides = [1, 1]} : vector<8x128xf32> to vector<1x128xf32>
    %9 = vector.extract_strided_slice %5 {offsets = [3, 0], sizes = [1, 128], strides = [1, 1]} : vector<8x128xf32> to vector<1x128xf32>
    %10 = vector.extract_strided_slice %5 {offsets = [4, 0], sizes = [1, 128], strides = [1, 1]} : vector<8x128xf32> to vector<1x128xf32>
    %11 = vector.extract_strided_slice %5 {offsets = [5, 0], sizes = [1, 128], strides = [1, 1]} : vector<8x128xf32> to vector<1x128xf32>
    %12 = vector.extract_strided_slice %5 {offsets = [6, 0], sizes = [1, 128], strides = [1, 1]} : vector<8x128xf32> to vector<1x128xf32>
    %13 = vector.extract_strided_slice %5 {offsets = [7, 0], sizes = [1, 1], strides = [1, 1]} : vector<8x128xf32> to vector<1x1xf32>
    %14 = vector.extract_strided_slice %3 {offsets = [0, 0], sizes = [8, 128], strides = [1, 1]} : vector<8x256xf32> to vector<8x128xf32>
    %15 = vector.broadcast %6 : vector<1x128xf32> to vector<8x128xf32>
    %16 = arith.addf %14, %15 : vector<8x128xf32>
    %cst_6 = arith.constant dense<0.000000e+00> : vector<8xf32>
    %17 = vector.multi_reduction <add>, %16, %cst_6 [1] : vector<8x128xf32> to vector<8xf32>
    %18 = vector.shape_cast %17 : vector<8xf32> to vector<8x1xf32>
    %cst_7 = arith.constant 1.280000e+02 : f32
    %19 = vector.broadcast %cst_7 : f32 to vector<8x1xf32>
    %20 = arith.divf %18, %19 : vector<8x1xf32>
    %21 = vector.broadcast %20 : vector<8x1xf32> to vector<8x128xf32>
    %22 = arith.subf %16, %21 : vector<8x128xf32>
    %23 = arith.mulf %22, %22 : vector<8x128xf32>
    %cst_8 = arith.constant dense<0.000000e+00> : vector<8xf32>
    %24 = vector.multi_reduction <add>, %23, %cst_8 [1] : vector<8x128xf32> to vector<8xf32>
    %25 = vector.shape_cast %24 : vector<8xf32> to vector<8x1xf32>
    %cst_9 = arith.constant 1.280000e+02 : f32
    %26 = vector.broadcast %cst_9 : f32 to vector<8x1xf32>
    %27 = arith.divf %25, %26 : vector<8x1xf32>
    %cst_10 = arith.constant 9.99999974E-6 : f32
    %28 = vector.broadcast %cst_10 : f32 to vector<8x1xf32>
    %29 = arith.addf %27, %28 : vector<8x1xf32>
    %30 = math.rsqrt %29 : vector<8x1xf32>
    %31 = vector.broadcast %30 : vector<8x1xf32> to vector<8x128xf32>
    %32 = arith.mulf %22, %31 : vector<8x128xf32>
    %33 = vector.broadcast %7 : vector<1x128xf32> to vector<8x128xf32>
    %34 = arith.mulf %32, %33 : vector<8x128xf32>
    %35 = vector.broadcast %8 : vector<1x128xf32> to vector<8x128xf32>
    %36 = arith.addf %34, %35 : vector<8x128xf32>
    %37 = math.tanh %36 : vector<8x128xf32>
    %38 = arith.truncf %37 : vector<8x128xf32> to vector<8x128xbf16>
    %c0_11 = arith.constant 0 : index
    %c0_12 = arith.constant 0 : index
    %c0_13 = arith.constant 0 : index
    %39 = vector.load %arg3[%c0_11, %c0_12, %c0_13] : memref<2x128x128xbf16, #tpu.memory_space<vmem>>, vector<1x128x128xbf16>
    %40 = vector.shape_cast %39 : vector<1x128x128xbf16> to vector<128x128xbf16>
    %cst_14 = arith.constant dense<0.000000e+00> : vector<8x128xf32>
    %41 = tpu.matmul %38, %40, %cst_14 {dimension_numbers = #tpu.dot_dimension_numbers<[1], [0], [0], [1], [0, 0, 1, 1], [], []>} : vector<8x128xbf16>, vector<128x128xbf16>, vector<8x128xf32> -> vector<8x128xf32>
    %42 = vector.broadcast %9 : vector<1x128xf32> to vector<8x128xf32>
    %43 = arith.addf %41, %42 : vector<8x128xf32>
    %cst_15 = arith.constant dense<0.000000e+00> : vector<8xf32>
    %44 = vector.multi_reduction <add>, %43, %cst_15 [1] : vector<8x128xf32> to vector<8xf32>
    %45 = vector.shape_cast %44 : vector<8xf32> to vector<8x1xf32>
    %cst_16 = arith.constant 1.280000e+02 : f32
    %46 = vector.broadcast %cst_16 : f32 to vector<8x1xf32>
    %47 = arith.divf %45, %46 : vector<8x1xf32>
    %48 = vector.broadcast %47 : vector<8x1xf32> to vector<8x128xf32>
    %49 = arith.subf %43, %48 : vector<8x128xf32>
    %50 = arith.mulf %49, %49 : vector<8x128xf32>
    %cst_17 = arith.constant dense<0.000000e+00> : vector<8xf32>
    %51 = vector.multi_reduction <add>, %50, %cst_17 [1] : vector<8x128xf32> to vector<8xf32>
    %52 = vector.shape_cast %51 : vector<8xf32> to vector<8x1xf32>
    %cst_18 = arith.constant 1.280000e+02 : f32
    %53 = vector.broadcast %cst_18 : f32 to vector<8x1xf32>
    %54 = arith.divf %52, %53 : vector<8x1xf32>
    %cst_19 = arith.constant 9.99999974E-6 : f32
    %55 = vector.broadcast %cst_19 : f32 to vector<8x1xf32>
    %56 = arith.addf %54, %55 : vector<8x1xf32>
    %57 = math.rsqrt %56 : vector<8x1xf32>
    %58 = vector.broadcast %57 : vector<8x1xf32> to vector<8x128xf32>
    %59 = arith.mulf %49, %58 : vector<8x128xf32>
    %60 = vector.broadcast %10 : vector<1x128xf32> to vector<8x128xf32>
    %61 = arith.mulf %59, %60 : vector<8x128xf32>
    %62 = vector.broadcast %11 : vector<1x128xf32> to vector<8x128xf32>
    %63 = arith.addf %61, %62 : vector<8x128xf32>
    %64 = math.tanh %63 : vector<8x128xf32>
    %65 = vector.broadcast %12 : vector<1x128xf32> to vector<8x128xf32>
    %66 = arith.mulf %64, %65 : vector<8x128xf32>
    %cst_20 = arith.constant dense<0.000000e+00> : vector<8xf32>
    %67 = vector.multi_reduction <add>, %66, %cst_20 [1] : vector<8x128xf32> to vector<8xf32>
    %68 = vector.shape_cast %67 : vector<8xf32> to vector<8x1xf32>
    %69 = vector.broadcast %13 : vector<1x1xf32> to vector<8x1xf32>
    %70 = arith.addf %68, %69 : vector<8x1xf32>
    %c1 = arith.constant 1 : index
    %c0_21 = arith.constant 0 : index
    %c0_22 = arith.constant 0 : index
    %71 = vector.load %arg4[%c1, %c0_21, %c0_22] : memref<2x8x128xf32, #tpu.memory_space<vmem>>, vector<1x8x128xf32>
    %72 = vector.shape_cast %71 : vector<1x8x128xf32> to vector<8x128xf32>
    %73 = vector.extract_strided_slice %72 {offsets = [0, 0], sizes = [1, 128], strides = [1, 1]} : vector<8x128xf32> to vector<1x128xf32>
    %74 = vector.extract_strided_slice %72 {offsets = [1, 0], sizes = [1, 128], strides = [1, 1]} : vector<8x128xf32> to vector<1x128xf32>
    %75 = vector.extract_strided_slice %72 {offsets = [2, 0], sizes = [1, 128], strides = [1, 1]} : vector<8x128xf32> to vector<1x128xf32>
    %76 = vector.extract_strided_slice %72 {offsets = [3, 0], sizes = [1, 128], strides = [1, 1]} : vector<8x128xf32> to vector<1x128xf32>
    %77 = vector.extract_strided_slice %72 {offsets = [4, 0], sizes = [1, 128], strides = [1, 1]} : vector<8x128xf32> to vector<1x128xf32>
    %78 = vector.extract_strided_slice %72 {offsets = [5, 0], sizes = [1, 128], strides = [1, 1]} : vector<8x128xf32> to vector<1x128xf32>
    %79 = vector.extract_strided_slice %72 {offsets = [6, 0], sizes = [1, 128], strides = [1, 1]} : vector<8x128xf32> to vector<1x128xf32>
    %80 = vector.extract_strided_slice %72 {offsets = [7, 0], sizes = [1, 1], strides = [1, 1]} : vector<8x128xf32> to vector<1x1xf32>
    %81 = vector.extract_strided_slice %3 {offsets = [0, 128], sizes = [8, 128], strides = [1, 1]} : vector<8x256xf32> to vector<8x128xf32>
    %82 = vector.broadcast %73 : vector<1x128xf32> to vector<8x128xf32>
    %83 = arith.addf %81, %82 : vector<8x128xf32>
    %cst_23 = arith.constant dense<0.000000e+00> : vector<8xf32>
    %84 = vector.multi_reduction <add>, %83, %cst_23 [1] : vector<8x128xf32> to vector<8xf32>
    %85 = vector.shape_cast %84 : vector<8xf32> to vector<8x1xf32>
    %cst_24 = arith.constant 1.280000e+02 : f32
    %86 = vector.broadcast %cst_24 : f32 to vector<8x1xf32>
    %87 = arith.divf %85, %86 : vector<8x1xf32>
    %88 = vector.broadcast %87 : vector<8x1xf32> to vector<8x128xf32>
    %89 = arith.subf %83, %88 : vector<8x128xf32>
    %90 = arith.mulf %89, %89 : vector<8x128xf32>
    %cst_25 = arith.constant dense<0.000000e+00> : vector<8xf32>
    %91 = vector.multi_reduction <add>, %90, %cst_25 [1] : vector<8x128xf32> to vector<8xf32>
    %92 = vector.shape_cast %91 : vector<8xf32> to vector<8x1xf32>
    %cst_26 = arith.constant 1.280000e+02 : f32
    %93 = vector.broadcast %cst_26 : f32 to vector<8x1xf32>
    %94 = arith.divf %92, %93 : vector<8x1xf32>
    %cst_27 = arith.constant 9.99999974E-6 : f32
    %95 = vector.broadcast %cst_27 : f32 to vector<8x1xf32>
    %96 = arith.addf %94, %95 : vector<8x1xf32>
    %97 = math.rsqrt %96 : vector<8x1xf32>
    %98 = vector.broadcast %97 : vector<8x1xf32> to vector<8x128xf32>
    %99 = arith.mulf %89, %98 : vector<8x128xf32>
    %100 = vector.broadcast %74 : vector<1x128xf32> to vector<8x128xf32>
    %101 = arith.mulf %99, %100 : vector<8x128xf32>
    %102 = vector.broadcast %75 : vector<1x128xf32> to vector<8x128xf32>
    %103 = arith.addf %101, %102 : vector<8x128xf32>
    %104 = math.tanh %103 : vector<8x128xf32>
    %105 = arith.truncf %104 : vector<8x128xf32> to vector<8x128xbf16>
    %c1_28 = arith.constant 1 : index
    %c0_29 = arith.constant 0 : index
    %c0_30 = arith.constant 0 : index
    %106 = vector.load %arg3[%c1_28, %c0_29, %c0_30] : memref<2x128x128xbf16, #tpu.memory_space<vmem>>, vector<1x128x128xbf16>
    %107 = vector.shape_cast %106 : vector<1x128x128xbf16> to vector<128x128xbf16>
    %cst_31 = arith.constant dense<0.000000e+00> : vector<8x128xf32>
    %108 = tpu.matmul %105, %107, %cst_31 {dimension_numbers = #tpu.dot_dimension_numbers<[1], [0], [0], [1], [0, 0, 1, 1], [], []>} : vector<8x128xbf16>, vector<128x128xbf16>, vector<8x128xf32> -> vector<8x128xf32>
    %109 = vector.broadcast %76 : vector<1x128xf32> to vector<8x128xf32>
    %110 = arith.addf %108, %109 : vector<8x128xf32>
    %cst_32 = arith.constant dense<0.000000e+00> : vector<8xf32>
    %111 = vector.multi_reduction <add>, %110, %cst_32 [1] : vector<8x128xf32> to vector<8xf32>
    %112 = vector.shape_cast %111 : vector<8xf32> to vector<8x1xf32>
    %cst_33 = arith.constant 1.280000e+02 : f32
    %113 = vector.broadcast %cst_33 : f32 to vector<8x1xf32>
    %114 = arith.divf %112, %113 : vector<8x1xf32>
    %115 = vector.broadcast %114 : vector<8x1xf32> to vector<8x128xf32>
    %116 = arith.subf %110, %115 : vector<8x128xf32>
    %117 = arith.mulf %116, %116 : vector<8x128xf32>
    %cst_34 = arith.constant dense<0.000000e+00> : vector<8xf32>
    %118 = vector.multi_reduction <add>, %117, %cst_34 [1] : vector<8x128xf32> to vector<8xf32>
    %119 = vector.shape_cast %118 : vector<8xf32> to vector<8x1xf32>
    %cst_35 = arith.constant 1.280000e+02 : f32
    %120 = vector.broadcast %cst_35 : f32 to vector<8x1xf32>
    %121 = arith.divf %119, %120 : vector<8x1xf32>
    %cst_36 = arith.constant 9.99999974E-6 : f32
    %122 = vector.broadcast %cst_36 : f32 to vector<8x1xf32>
    %123 = arith.addf %121, %122 : vector<8x1xf32>
    %124 = math.rsqrt %123 : vector<8x1xf32>
    %125 = vector.broadcast %124 : vector<8x1xf32> to vector<8x128xf32>
    %126 = arith.mulf %116, %125 : vector<8x128xf32>
    %127 = vector.broadcast %77 : vector<1x128xf32> to vector<8x128xf32>
    %128 = arith.mulf %126, %127 : vector<8x128xf32>
    %129 = vector.broadcast %78 : vector<1x128xf32> to vector<8x128xf32>
    %130 = arith.addf %128, %129 : vector<8x128xf32>
    %131 = math.tanh %130 : vector<8x128xf32>
    %132 = vector.broadcast %79 : vector<1x128xf32> to vector<8x128xf32>
    %133 = arith.mulf %131, %132 : vector<8x128xf32>
    %cst_37 = arith.constant dense<0.000000e+00> : vector<8xf32>
    %134 = vector.multi_reduction <add>, %133, %cst_37 [1] : vector<8x128xf32> to vector<8xf32>
    %135 = vector.shape_cast %134 : vector<8xf32> to vector<8x1xf32>
    %136 = vector.broadcast %80 : vector<1x1xf32> to vector<8x1xf32>
    %137 = arith.addf %135, %136 : vector<8x1xf32>
    %138 = tpu.concatenate %70, %137 in 1 : vector<8x1xf32>, vector<8x1xf32> -> vector<8x2xf32>
    %c0_38 = arith.constant 0 : index
    %c0_39 = arith.constant 0 : index
    %139 = vector.load %arg5[%c0_38, %c0_39] : memref<8x2xf32, #tpu.memory_space<vmem>>, vector<8x2xf32>
    tpu.vector_store %arg5[%c0_38, %c0_39], %138 {strides = array<i32>} : memref<8x2xf32, #tpu.memory_space<vmem>>, vector<8x2xf32>,
    return
  }
  func.func @transform_0(%arg0: i32) -> (i32, i32) {
    %c0_i32 = arith.constant 0 : i32
    %c0_i32_0 = arith.constant 0 : i32
    %c0_i32_1 = arith.constant 0 : i32
    return %c0_i32, %c0_i32_0 : i32, i32
  }
  func.func @transform_1(%arg0: i32) -> (i32, i32) {
    %c0_i32 = arith.constant 0 : i32
    %c0_i32_0 = arith.constant 0 : i32
    %c0_i32_1 = arith.constant 0 : i32
    return %c0_i32, %c0_i32_0 : i32, i32
  }
  func.func @transform_2(%arg0: i32) -> (i32, i32, i32) {
    %c0_i32 = arith.constant 0 : i32
    %c0_i32_0 = arith.constant 0 : i32
    %c0_i32_1 = arith.constant 0 : i32
    %c0_i32_2 = arith.constant 0 : i32
    return %c0_i32, %c0_i32_0, %c0_i32_1 : i32, i32, i32
  }
  func.func @transform_3(%arg0: i32) -> (i32, i32, i32) {
    %c0_i32 = arith.constant 0 : i32
    %c0_i32_0 = arith.constant 0 : i32
    %c0_i32_1 = arith.constant 0 : i32
    %c0_i32_2 = arith.constant 0 : i32
    return %c0_i32, %c0_i32_0, %c0_i32_1 : i32, i32, i32
  }
  func.func @transform_4(%arg0: i32) -> (i32, i32) {
    %c0_i32 = arith.constant 0 : i32
    %c0_i32_0 = arith.constant 0 : i32
    %c0_i32_1 = arith.constant 0 : i32
    return %c0_i32, %c0_i32_0 : i32, i32
  }
}

</mosaic_0001>

<bundles_post_ra>
// kernel: critic_forward.1
= control target key start
LH: loop header
LB: loop body
LE: loop exit
PB: predicated region body
PF: predicated region fallthrough
CT: control target
= control target key end

     0   :  { %9 = vsyncpa [#allocation3], 0  ;;  %s593_s15 = smov [#allocation2]   ;;  %s695_s0 = inlined_call_operand.vmem [shape: f32[8,16], index: 0, kind: input, shape index: {}]   ;;  %s696_s1 = inlined_call_operand.vmem [shape: bf16[16,256], index: 1, kind: input, shape index: {}]   ;;  %s697_s2 = inlined_call_operand.hbm [shape: bf16[2,128,128], index: 2, kind: input, shape index: {}]   ;;  %s698_s3 = inlined_call_operand.vmem [shape: f32[2,8,128], index: 3, kind: input, shape index: {}]   ;;  %s699_s4 = inlined_call_operand.vmem [shape: f32[8,2], index: 4, kind: output, shape index: {}]  }
   0x1   :  { %s19_s16 = sshll.u32 %s593_s15, 4  ;;  %s569_s19 = scalar_lea.hbm %s697_s2, 2048  ;;  %s20_s16 = int_to_ptr.vmem [resolvable:$true] %s19_s16 }
   0x2   :  { %p570_p0 = scmp.ne.s32.totalorder %s697_s2, %s569_s19  ;;  %p573_p1 = scmp.lt.u32.totalorder %s569_s19, %s697_s2 }
   0x4   :  { %p575_p2 = pnand %p573_p1, %p570_p0 }
   0x6   :  { %578 = shalt.err (!%p575_p2)
}
   0x7   :  { %s579_s24 = scalar_lea.vmem %s20_s16, 2048  ;;  %p584_p4 = scmp.lt.s32.totalorder %s20_s16, %s20_s16 }
   0x8   :  { %p580_p3 = scmp.ne.s32.totalorder %s20_s16, %s579_s24  ;;  %p585_p5 = scmp.lt.s32.totalorder %s579_s24, %s579_s24 }
   0xa   :  { %p586_p6 = por %p585_p5, %p584_p4 }
   0xc   :  { %p587_p7 = pnand %p586_p6, %p580_p3 }
   0xe   :  { %590 = shalt.err (!%p587_p7)
}
   0xf   :  { %s594_s25 = smov 64   ;;  %s595_s26 = smov 4  }
  0x10   :  { %25 = dma.hbm_to_vmem [thread:$0]  %s697_s2, 2048, %s20_s16, [#allocation3], %s594_s25, %s594_s25, %s595_s26  }
  0x11   :  { %591 = dma.done.wait [#allocation3], 2048  }
  0x12   :  { %592 = vsyncadd [#allocation3], 4294965248  ;;  %v596_v0 = vmov 0   ;;  %v534_v1 = vld [vmem:[%s696_s1 + $0x4] ss:$8 sps:$4 sm:$0xff]   ;;  %vm46_vm0 = vcmask 130048   ;;  %v92_v5 = vlaneseq }
  0x13   :  { %82 = vmatprep.mubr.bf16.mxu0 %v596_v0  ;;  %v536_v2 = vld [vmem:[%s696_s1] ss:$8 sps:$4 sm:$0xff]   ;;  %50 = vmatprep.subr.bf16.mxu0 %v534_v1  ;;  %v597_v27 = vmov 0.0   ;;  %v541_v31 = vld [vmem:[#allocation2 + $0x50] sm:$0xff]   ;;  %v543_v33 = vld [vmem:[#allocation2 + $0x58] sm:$0xff]   ;;  %vm598_vm1 = vmmov 0  }
  0x14   :  { %v32_v3 = vld [vmem:[%s695_s0] sm:$0xff]  ;;  %51 = vmatpush1.bf16.msra.mxu0 %v536_v2  ;;  %v646_v6 = vshrl.u32 %v92_v5, 7  ;;  %v652_v8 = vld [vmem:[%s698_s3 + $0x8] sm:$0xff]  ;;  %487 = vmatprep.subr.bf16.mxu1 %v597_v27  ;;  %v542_v32 = vld [vmem:[#allocation2 + $0x10] sm:$0xff]   ;;  %s599_s0 = smov 1   ;;  %vm440_vm2 = vcmask 7168  }
  0x15   :  { %v33_v4 = vpack.c.bf16 %v32_v3, %v32_v3  ;;  %v658_v10 = vld [vmem:[%s698_s3] sm:$0xff]  ;;  %507 = vmatprep.subr.bf16.mxu0 %v597_v27  ;;  %v539_v29 = vld [vmem:[#allocation2 + $0x48] sm:$0xff]   ;;  %v544_v34 = vld [vmem:[#allocation2 + $0x18] sm:$0xff]   ;;  %503 = vmatprep.mubr.msk.bf16.mxu1 %vm598_vm1, %v597_v27  ;;  %vm442_vm3 = vcmask 15360  }
  0x16   :  { %v94_v7 = vsub.s32 0, %v646_v6  ;;  %v537_v26 = vld [vmem:[#allocation2 + $0x40] sm:$0xff]   ;;  %v540_v30 = vld [vmem:[#allocation2 + $0x8] sm:$0xff]   ;;  %v549_v39 = vld [vmem:[#allocation2 + $0x70] sm:$0xff]   ;;  %v111_v49 = vsub.s32 1, %v646_v6  ;;  %v116_v50 = vsub.s32 2, %v646_v6 }
  0x17   :  { %451 = vmatmul.mubr.msk.bf16.vlgmr.msra.gmra.mrb[0].mxu0 %vm46_vm0, %v33_v4  ;;  %v538_v28 = vld [vmem:[#allocation2] sm:$0xff]   ;;  %v547_v37 = vld [vmem:[#allocation2 + $0x68] sm:$0xff]   ;;  %v550_v40 = vld [vmem:[#allocation2 + $0x30] sm:$0xff]   ;;  %v139_v3 = vsub.s32 3, %v646_v6 }
  0x18   :  { %v268_v9 = vrot.slane %v652_v8, %v94_v7  ;;  %v95_v13 = vrot.slane %v658_v10, %v94_v7  ;;  %508 = vmatpush3.bf16.msra.mxu0 %v537_v26  ;;  %488 = vmatpush3.bf16.msra.mxu1 %v538_v28  ;;  %v545_v35 = vld [vmem:[#allocation2 + $0x60] sm:$0xff]   ;;  %v548_v38 = vld [vmem:[#allocation2 + $0x28] sm:$0xff]   ;;  %v551_v41 = vld [vmem:[#allocation2 + $0x78] sm:$0xff]   ;;  %v284_v51 = vrot.slane %v652_v8, %v111_v49 }
  0x19   :  { %509 = vmatprep.subr.bf16.mxu0 %v597_v27  ;;  %489 = vmatprep.subr.bf16.mxu1 %v597_v27  ;;  %v546_v36 = vld [vmem:[#allocation2 + $0x20] sm:$0xff]   ;;  %v552_v42 = vld [vmem:[#allocation2 + $0x38] sm:$0xff]   ;;  %v289_v54 = vrot.slane %v652_v8, %v116_v50  ;;  %v112_v56 = vrot.slane %v658_v10, %v111_v49  ;;  %v117_v60 = vrot.slane %v658_v10, %v116_v50 }
  0x1a   :  { %523 = vmatprep.mubr.msk.bf16.mxu0 %vm598_vm1, %v597_v27  ;;  %v313_v4 = vrot.slane %v652_v8, %v139_v3 }
  0x1c   :  { %510 = vmatpush3.bf16.msra.mxu0 %v539_v29  ;;  %490 = vmatpush3.bf16.msra.mxu1 %v540_v30 }
  0x1d   :  { %511 = vmatprep.subr.bf16.mxu0 %v597_v27  ;;  %491 = vmatprep.subr.bf16.mxu1 %v597_v27 }
  0x20   :  { %512 = vmatpush3.bf16.msra.mxu0 %v541_v31  ;;  %492 = vmatpush3.bf16.msra.mxu1 %v542_v32 }
  0x21   :  { %513 = vmatprep.subr.bf16.mxu0 %v597_v27  ;;  %493 = vmatprep.subr.bf16.mxu1 %v597_v27 }
  0x24   :  { %514 = vmatpush3.bf16.msra.mxu0 %v543_v33  ;;  %494 = vmatpush3.bf16.msra.mxu1 %v544_v34  ;;  %v242_v33 = vsub.s32 4, %v646_v6  ;;  %v247_v34 = vsub.s32 5, %v646_v6 }
  0x25   :  { %515 = vmatprep.subr.bf16.mxu0 %v597_v27  ;;  %495 = vmatprep.subr.bf16.mxu1 %v597_v27 }
  0x28   :  { %516 = vmatpush3.bf16.msra.mxu0 %v545_v35  ;;  %496 = vmatpush3.bf16.msra.mxu1 %v546_v36  ;;  %v416_v35 = vrot.slane %v652_v8, %v242_v33 }
  0x29   :  { %517 = vmatprep.subr.bf16.mxu0 %v597_v27  ;;  %497 = vmatprep.subr.bf16.mxu1 %v597_v27 }
  0x2c   :  { %518 = vmatpush3.bf16.msra.mxu0 %v547_v37  ;;  %498 = vmatpush3.bf16.msra.mxu1 %v548_v38  ;;  %v421_v38 = vrot.slane %v652_v8, %v247_v34 }
  0x2d   :  { %519 = vmatprep.subr.bf16.mxu0 %v597_v27  ;;  %499 = vmatprep.subr.bf16.mxu1 %v597_v27 }
  0x30   :  { %520 = vmatpush3.bf16.msra.mxu0 %v549_v39  ;;  %500 = vmatpush3.bf16.msra.mxu1 %v550_v40  ;;  %v243_v40 = vrot.slane %v658_v10, %v242_v33 }
  0x31   :  { %521 = vmatprep.subr.bf16.mxu0 %v597_v27  ;;  %501 = vmatprep.subr.bf16.mxu1 %v597_v27 }
  0x34   :  { %522 = vmatpush3.bf16.msra.mxu0 %v551_v41  ;;  %502 = vmatpush3.bf16.msra.mxu1 %v552_v42 }
  0xea   :  { %v84_v11 = vpop.f32.mrb[0].mxu0 }
  0xeb   :  { %v86_v12 = vpop.f32.mrb[1].mxu0  ;;  %v96_v17 = vadd.f32 %v95_v13, %v84_v11  ;;  %v140_v11 = vrot.slane %v658_v10, %v139_v3 }
  0xec   :  { %v269_v14 = vadd.f32 %v268_v9, %v86_v12  ;;  %v88_v15 = vpop.f32.mrb[2].mxu0 }
  0xed   :  { %v89_v16 = vpop.f32.mrb[3].mxu0 }
  0xee   :  { %270 = vadd.xlane.f32.xlu0 %v269_v14 }
  0xf2   :  { %97 = vadd.xlane.f32.xlu0 %v96_v17 }
 0x17b   :  { %v271_v18 = vpop.xlane.xlu0 %270 }
 0x17c   :  { %v272_v19 = vmul.f32 0.0078125, %v271_v18 }
 0x17e   :  { %v661_v20 = vsub.f32 %v269_v14, %v272_v19 }
 0x17f   :  { %v98_v21 = vpop.xlane.xlu0 %97 }
 0x180   :  { %v100_v22 = vmul.f32 0.0078125, %v98_v21  ;;  %v274_v23 = vmul.f32 %v661_v20, %v661_v20 }
 0x182   :  { %v665_v24 = vsub.f32 %v96_v17, %v100_v22  ;;  %275 = vadd.xlane.f32.xlu1 %v274_v23 }
 0x184   :  { %v102_v25 = vmul.f32 %v665_v24, %v665_v24 }
 0x186   :  { %103 = vadd.xlane.f32.xlu1 %v102_v25 }
 0x20f   :  { %v276_v43 = vpop.xlane.xlu1 %275 }
 0x210   :  { %v277_v44 = vmul.f32 0.0078125, %v276_v43 }
 0x212   :  { %v278_v45 = vadd.f32 1e-05, %v277_v44  ;;  %v248_v44 = vrot.slane %v658_v10, %v247_v34 }
 0x213   :  { %v104_v46 = vpop.xlane.xlu1 %103 }
 0x214   :  { %553 = vrsqrt.f32 %v278_v45  ;;  %v105_v47 = vmul.f32 0.0078125, %v104_v46 }
 0x216   :  { %v106_v48 = vadd.f32 1e-05, %v105_v47  ;;  %v253_v47 = vsub.s32 6, %v646_v6 }
 0x218   :  { %555 = vrsqrt.f32 %v106_v48  ;;  %v427_v48 = vrot.slane %v652_v8, %v253_v47 }
 0x21e   :  { %v554_v52 = vpop.eup %553 }
 0x21f   :  { %v280_v53 = vmul.f32 %v554_v52, %v661_v20 }
 0x221   :  { %v285_v55 = vmul.f32 %v284_v51, %v280_v53  ;;  %v254_v51 = vrot.slane %v658_v10, %v253_v47 }
 0x222   :  { %v556_v57 = vpop.eup %555 }
 0x223   :  { %v290_v58 = vadd.f32 %v289_v54, %v285_v55  ;;  %v108_v59 = vmul.f32 %v556_v57, %v665_v24  ;;  %v260_v54 = vsub.s32 7, %v646_v6 }
 0x225   :  { %557 = vtanh.f32 %v290_v58  ;;  %v113_v61 = vmul.f32 %v112_v56, %v108_v59  ;;  %v434_v55 = vrot.slane %v652_v8, %v260_v54  ;;  %v261_v58 = vrot.slane %v658_v10, %v260_v54 }
 0x227   :  { %v118_v62 = vadd.f32 %v117_v60, %v113_v61 }
 0x229   :  { %559 = vtanh.f32 %v118_v62 }
 0x22f   :  { %v558_v63 = vpop.eup %557 }
 0x230   :  { %v292_v0 = vpack.c.bf16 %v558_v63, %v558_v63 }
 0x232   :  { %524 = vmatmul.mubr.bf16.vlgmr.msra.gmra.mrb[4].mxu0 %v292_v0 }
 0x233   :  { %v560_v1 = vpop.eup %559 }
 0x234   :  { %v120_v2 = vpack.c.bf16 %v560_v1, %v560_v1 }
 0x236   :  { %504 = vmatmul.mubr.bf16.vlgmr.msra.gmra.mrb[0].mxu1 %v120_v2 }
 0x305   :  { %v396_v5 = vpop.f32.mrb[4].mxu0 }
 0x306   :  { %v397_v7 = vadd.f32 %v396_v5, %v313_v4  ;;  %v525_v9 = vpop.f32.mrb[5].mxu0 }
 0x307   :  { %v399_v12 = vpop.f32.mrb[6].mxu0 }
 0x308   :  { %402 = vadd.xlane.f32.xlu0 %v397_v7  ;;  %v526_v13 = vpop.f32.mrb[7].mxu0 }
 0x309   :  { %v223_v14 = vpop.f32.mrb[0].mxu1 }
 0x30a   :  { %v224_v15 = vadd.f32 %v223_v14, %v140_v11  ;;  %v505_v16 = vpop.f32.mrb[1].mxu1 }
 0x30b   :  { %v226_v17 = vpop.f32.mrb[2].mxu1 }
 0x30c   :  { %229 = vadd.xlane.f32.xlu1 %v224_v15  ;;  %v506_v18 = vpop.f32.mrb[3].mxu1 }
 0x395   :  { %v403_v19 = vpop.xlane.xlu0 %402 }
 0x396   :  { %v404_v20 = vmul.f32 0.0078125, %v403_v19 }
 0x398   :  { %v405_v21 = vsub.f32 %v397_v7, %v404_v20 }
 0x399   :  { %v230_v22 = vpop.xlane.xlu1 %229 }
 0x39a   :  { %v231_v23 = vmul.f32 0.0078125, %v230_v22  ;;  %v406_v24 = vmul.f32 %v405_v21, %v405_v21 }
 0x39c   :  { %v232_v25 = vsub.f32 %v224_v15, %v231_v23  ;;  %407 = vadd.xlane.f32.xlu0 %v406_v24 }
 0x39e   :  { %v233_v26 = vmul.f32 %v232_v25, %v232_v25 }
 0x3a0   :  { %234 = vadd.xlane.f32.xlu1 %v233_v26 }
 0x429   :  { %v408_v27 = vpop.xlane.xlu0 %407 }
 0x42a   :  { %v409_v28 = vmul.f32 0.0078125, %v408_v27 }
 0x42c   :  { %v410_v29 = vadd.f32 1e-05, %v409_v28 }
 0x42d   :  { %v235_v30 = vpop.xlane.xlu1 %234 }
 0x42e   :  { %561 = vrsqrt.f32 %v410_v29  ;;  %v236_v31 = vmul.f32 0.0078125, %v235_v30 }
 0x430   :  { %v237_v32 = vadd.f32 1e-05, %v236_v31 }
 0x432   :  { %563 = vrsqrt.f32 %v237_v32 }
 0x438   :  { %v562_v36 = vpop.eup %561 }
 0x439   :  { %v412_v37 = vmul.f32 %v562_v36, %v405_v21 }
 0x43b   :  { %v417_v39 = vmul.f32 %v416_v35, %v412_v37 }
 0x43c   :  { %v564_v41 = vpop.eup %563 }
 0x43d   :  { %v239_v42 = vmul.f32 %v564_v41, %v232_v25  ;;  %v422_v43 = vadd.f32 %v421_v38, %v417_v39 }
 0x43f   :  { %v244_v45 = vmul.f32 %v243_v40, %v239_v42  ;;  %565 = vtanh.f32 %v422_v43 }
 0x441   :  { %v249_v46 = vadd.f32 %v248_v44, %v244_v45 }
 0x443   :  { %567 = vtanh.f32 %v249_v46 }
 0x449   :  { %v566_v49 = vpop.eup %565 }
 0x44a   :  { %v428_v50 = vmul.f32 %v566_v49, %v427_v48 }
 0x44c   :  { %429 = vadd.xlane.f32.xlu0 %v428_v50 }
 0x44d   :  { %v568_v52 = vpop.eup %567 }
 0x44e   :  { %v255_v53 = vmul.f32 %v568_v52, %v254_v51 }
 0x450   :  { %256 = vadd.xlane.f32.xlu1 %v255_v53 }
 0x4d9   :  { %v430_v56 = vpop.xlane.xlu0 %429 }
 0x4da   :  { %v435_v57 = vadd.f32 %v434_v55, %v430_v56 }
 0x4dc   :  { %437 = vrot.lane.b32.xlu0 %v435_v57, %s599_s0 }
 0x4dd   :  { %v257_v59 = vpop.xlane.xlu1 %256 }
 0x4de   :  { %v262_v60 = vadd.f32 %v261_v58, %v257_v59 }
 0x54e   :  { %v438_v61 = vpop.permute.xlu0 %437 }
 0x54f   :  { %v441_v62 = vsel %vm440_vm2, %v262_v60, %v438_v61 }
 0x550   :  { %443 = vst.msk [vmem:[%s699_s4] sm:$0xff] %vm442_vm3, %v441_v62 }
 0x551   :  { %448 = vsyncpa [#allocation3], 1 }

</bundles_post_ra>
